<compile_context>
chip_gen: v7x
topology: tpu7x:2x2x1
jax: 0.10.0
libtpu: 0.0.40
codegen_flags: <defaults>
</compile_context>

<pallas_src>
import jax
import jax.numpy as jnp
import numpy as np
from jax.experimental import pallas as pl
from jax.experimental.pallas import tpu as pltpu

_KSIZE = 30            # motion-blur kernel size from the reference module
_ANCHOR = _KSIZE // 2  # cv2 default anchor column for a 30-wide kernel -> 15
_LANE = 128


def _round_up(x, m):
    return -(-x // m) * m


def _reflect101_np(idx, n):
    """Vectorized cv2 BORDER_REFLECT_101 folding of indices into [0, n)."""
    if n == 1:
        return np.zeros_like(idx)
    period = 2 * (n - 1)
    idx = np.mod(idx, period)
    return np.where(idx < n, idx, period - idx)


def _motion_blur_counts(w, wp):
    """(Wp, Wp) integer tap-count matrix M30 (= 30 * blur matrix).

    (row @ M30)[x] = sum of the 30 horizontal reflect-101 taps for output
    column x < w; columns >= w (zero padding) get all-zero weights.  Entries
    are small non-negative integers, exactly representable in bf16.
    """
    m = np.zeros((wp, wp), dtype=np.float32)
    cols = np.arange(w)
    for t in range(_KSIZE):
        src = _reflect101_np(cols + t - _ANCHOR, w)
        np.add.at(m, (src, cols), 1.0)
    return m


def _moblur_kernel(m_ref, x_ref, prev_ref, o_ref):
    """One (TH, Wp) row tile of one channel plane.

    m_ref    : (Wp, Wp) bf16 tap-count matrix, resident in VMEM for the grid
    x_ref    : (1, TH, Wp) source rows [r0, r0+TH)
    prev_ref : (1, PH, Wp) the PH rows ending just above the tile
               (last row = source row r0-1 halo)
    o_ref    : (1, TH, Wp) output rows [r0, r0+TH)
    """
    rt = pl.program_id(1)
    ph = prev_ref.shape[1]

    x = x_ref[0]                                      # (TH, Wp)
    halo = prev_ref[0, ph - 1:ph, :]                  # (1, Wp) = src row r0-1
    # First row tile: source row -1 reflects (REFLECT_101) onto row +1; the
    # clamped halo block fetched by prev_map is intentionally ignored here
    # (keep this branch and prev_map's clamp-to-0 in sync).
    top = jnp.where(rt == 0, x[1:2, :], halo)

    # Shift the source up by one row (out row y reads src row r0 + y - 1) by
    # stitching the single halo/reflect row on top of rows [0, TH-1).
    x_src = jnp.concatenate(
        [top.astype(jnp.bfloat16), x[:-1, :].astype(jnp.bfloat16)], axis=0)

    # Horizontal 30-tap reflect-101 box sum as one bf16 MXU matmul with exact
    # integer weights and an f32 accumulator; one VPU multiply for the 1/30.
    acc = jnp.dot(x_src, m_ref[...], preferred_element_type=jnp.float32)
    o_ref[0] = (acc * np.float32(1.0 / _KSIZE)).astype(o_ref.dtype)


def _sublane(itemsize):
    """Sublane tile for the dtype: 8 for f32, 16 for bf16, 32 for int8."""
    return max(8, 32 // itemsize)


def _vmem_capacity_bytes():
    try:
        return int(pltpu.get_tpu_info().vmem_capacity_bytes)
    except Exception:
        return 128 * 1024 * 1024


def _pick_row_tile(h, wp, itemsize, sub, n_planes, target_bytes):
    """Row-tile height TH: multiple of `sub` (or == H for tiny H), about
    `target_bytes` of input per tile, and >= 2 row tiles for a single plane so
    both v7x TensorCores get work."""
    if h <= sub:
        return h
    h_floor = (h // sub) * sub
    th = max(sub, (target_bytes // (wp * itemsize)) // sub * sub)
    th = min(th, h_floor)
    if n_planes == 1 and th >= h:
        th = max(sub, _round_up(h // 2, sub))
    return th


def motion_blur30(img, blur_counts=None):
    """Apply the RecoverMoblur 30-tap motion blur to an NCHW float image."""
    n, c, h, w = img.shape
    assert h >= 2, "motion blur needs at least 2 rows (reflect-101 of row -1)"
    assert jnp.issubdtype(img.dtype, jnp.floating), "float NCHW input expected"

    wp = _round_up(w, _LANE)                     # lane-dense last dim
    if blur_counts is None:
        blur_counts = _motion_blur_counts(w, wp)
    m_bf16 = jnp.asarray(blur_counts, dtype=jnp.bfloat16)
    assert m_bf16.shape == (wp, wp)

    b = n * c
    x = img.reshape(b, h, w)
    if wp != w:
        x = jnp.pad(x, ((0, 0), (0, 0), (0, wp - w)))

    itemsize = np.dtype(img.dtype).itemsize
    sub = _sublane(itemsize)

    vmem_cap = _vmem_capacity_bytes()
    small_vmem = vmem_cap <= 64 * 1024 * 1024            # v7x-class VMEM
    target_tile_bytes = (3 << 19) if small_vmem else (3 << 20)   # 1.5 / 3 MiB
    th = _pick_row_tile(h, wp, itemsize, sub, b, target_tile_bytes)
    ph = sub if th % sub == 0 else th                    # tiny-height fallback
    n_row_tiles = pl.cdiv(h, th)
    blocks_per_tile = th // ph                           # halo index in PH-row blocks

    # VMEM budget from the actual footprint (M counted twice in case the
    # single-buffer request is unavailable, double-buffered in/out tiles +
    # halo, in-kernel bf16/f32 temporaries, headroom), clamped per generation.
    tile_bytes = th * wp * itemsize
    halo_bytes = ph * wp * itemsize
    m_bytes = wp * wp * 2
    temp_bytes = th * wp * (2 + 4)
    need = 2 * m_bytes + 4 * tile_bytes + 2 * halo_bytes + temp_bytes + (4 << 20)
    vmem_limit = int(min(max(need, 32 << 20),
                         (48 << 20) if small_vmem else (96 << 20)))

    def m_map(bi, rt):
        return (0, 0)                     # constant -> stays resident in VMEM

    def x_map(bi, rt):
        return (bi, rt, 0)

    def prev_map(bi, rt):
        # PH-row block ending just above the tile.  Clamped to block 0 for the
        # first row tile, where the kernel's rt==0 branch ignores it and
        # reflects inside the tile instead.
        return (bi, jnp.maximum(rt * blocks_per_tile - 1, 0), 0)

    def build(single_buffer_m):
        m_kwargs = ({"pipeline_mode": pl.Buffered(buffer_count=1)}
                    if single_buffer_m else {})
        grid_spec = pltpu.PrefetchScalarGridSpec(
            num_scalar_prefetch=0,
            grid=(b, n_row_tiles),
            in_specs=[
                pl.BlockSpec((wp, wp), m_map, **m_kwargs),
                pl.BlockSpec((1, th, wp), x_map),
                pl.BlockSpec((1, ph, wp), prev_map),
            ],
            out_specs=pl.BlockSpec((1, th, wp), x_map),
        )
        return pl.pallas_call(
            _moblur_kernel,
            out_shape=jax.ShapeDtypeStruct((b, h, wp), img.dtype),
            grid_spec=grid_spec,
            compiler_params=pltpu.CompilerParams(
                dimension_semantics=("parallel", "parallel"),
                vmem_limit_bytes=vmem_limit,
            ),
        )

    try:
        # Single-buffer the resident blur matrix (constant index_map).
        out = build(True)(m_bf16, x, x)
    except Exception:
        # pipeline_mode / Buffered(1) unsupported on this JAX version.
        out = build(False)(m_bf16, x, x)

    if wp != w:
        out = out[:, :, :w]
    return out.reshape(n, c, h, w)


class RecoverMoblurPallas:
    """JAX/Pallas port of RecoverMoblur(p).

    The p-coin is drawn once (deterministically from `key`) in __init__ so the
    forward pass is reproducible; per-call torch.rand semantics differ.  The
    tap-count matrix depends only on the image width and is cached per width.
    """

    def __init__(self, p=0.5, key=jax.random.PRNGKey(0)):
        self.p = p
        self._apply = bool(jax.random.uniform(key) < p)
        self._counts = {}

    def __call__(self, img):
        if not self._apply:
            return img
        w = img.shape[-1]
        if w not in self._counts:
            self._counts[w] = _motion_blur_counts(w, _round_up(w, _LANE))
        return motion_blur30(img, self._counts[w])


def _reference_moblur(img):
    """Pure-jnp reference: cv2.filter2D semantics for the 30x30 motion kernel."""
    n, c, h, w = img.shape
    x = img.astype(jnp.float32)
    # Source row is y-1 (anchor row 15 vs. nonzero row 14), reflect-101 at top.
    xr = jnp.pad(x, ((0, 0), (0, 0), (1, 0), (0, 0)), mode="reflect")[:, :, :h, :]
    # Horizontal window covers columns [x-15, x+14], reflect-101 at both edges.
    xp = jnp.pad(xr, ((0, 0), (0, 0), (0, 0), (_ANCHOR, _KSIZE - 1 - _ANCHOR)),
                 mode="reflect")
    out = jnp.zeros_like(x)
    for t in range(_KSIZE):
        out = out + xp[:, :, :, t:t + w]
    return (out / float(_KSIZE)).astype(img.dtype)


if __name__ == "__main__":
    key = jax.random.PRNGKey(0)
    k_img, k_mod = jax.random.split(key)

    N, C, H, W = 2, 4, 16, 16
    img = jax.random.uniform(k_img, (N, C, H, W), dtype=jnp.float32) * 255.0

    # p=1.0 so the Pallas blur path definitely runs in the demo.
    module = RecoverMoblurPallas(p=1.0, key=k_mod)
    out = jax.block_until_ready(module(img))

    ref = _reference_moblur(img)
    assert out.shape == img.shape and out.dtype == img.dtype
    # bf16 quantization of the 0..255 inputs bounds the error by ~0.5 (tap
    # weights are exact integers, f32 accumulate, f32 1/30 post-scale); any
    # reflect / shift indexing bug would produce O(1..10) errors.
    max_err = float(jnp.max(jnp.abs(out - ref)))
    assert max_err <= 0.75, f"max abs err = {max_err}"
    print("KERNEL_OK")
</pallas_src>

<mosaic_0001>
module attributes {stable_mosaic.version = 11 : i64} {
  func.func @_moblur_kernel(%arg0: i32, %arg1: i32, %arg2: memref<128x128xbf16, #tpu.memory_space<vmem>>, %arg3: memref<1x16x128xf32, #tpu.memory_space<vmem>>, %arg4: memref<1x8x128xf32, #tpu.memory_space<vmem>>, %arg5: memref<1x16x128xf32, #tpu.memory_space<vmem>>) attributes {dimension_semantics = [#tpu.dimension_semantics<parallel>, #tpu.dimension_semantics<parallel>], iteration_bounds = array<i64: 8, 1>, scalar_prefetch = 0 : i64, scratch_operands = 0 : i64, tpu.core_type = #tpu.core_type<tc>, window_params = [{pipeline_mode = #tpu.pipeline_mode<synchronous>, transform_indices = @transform_0, window_bounds = array<i64: 128, 128>}, {transform_indices = @transform_1, window_bounds = array<i64: 1, 16, 128>}, {transform_indices = @transform_2, window_bounds = array<i64: 1, 8, 128>}, {transform_indices = @transform_3, window_bounds = array<i64: 1, 16, 128>}]} {
    %c0 = arith.constant 0 : index
    %c0_0 = arith.constant 0 : index
    %c0_1 = arith.constant 0 : index
    %0 = vector.load %arg3[%c0, %c0_0, %c0_1] : memref<1x16x128xf32, #tpu.memory_space<vmem>>, vector<1x16x128xf32>
    %1 = vector.shape_cast %0 : vector<1x16x128xf32> to vector<16x128xf32>
    %c0_2 = arith.constant 0 : index
    %c7 = arith.constant 7 : index
    %c0_3 = arith.constant 0 : index
    %2 = vector.load %arg4[%c0_2, %c7, %c0_3] : memref<1x8x128xf32, #tpu.memory_space<vmem>>, vector<1x1x128xf32>
    %3 = vector.shape_cast %2 : vector<1x1x128xf32> to vector<1x128xf32>
    %c0_i32 = arith.constant 0 : i32
    %4 = arith.cmpi eq, %arg1, %c0_i32 : i32
    %5 = vector.extract_strided_slice %1 {offsets = [1, 0], sizes = [1, 128], strides = [1, 1]} : vector<16x128xf32> to vector<1x128xf32>
    %6 = arith.select %4, %5, %3 : vector<1x128xf32>
    %7 = arith.truncf %6 : vector<1x128xf32> to vector<1x128xbf16>
    %8 = vector.extract_strided_slice %1 {offsets = [0, 0], sizes = [15, 128], strides = [1, 1]} : vector<16x128xf32> to vector<15x128xf32>
    %9 = arith.truncf %8 : vector<15x128xf32> to vector<15x128xbf16>
    %10 = tpu.concatenate %7, %9 in 0 : vector<1x128xbf16>, vector<15x128xbf16> -> vector<16x128xbf16>
    %c0_4 = arith.constant 0 : index
    %c0_5 = arith.constant 0 : index
    %11 = vector.load %arg2[%c0_4, %c0_5] : memref<128x128xbf16, #tpu.memory_space<vmem>>, vector<128x128xbf16>
    %cst = arith.constant dense<0.000000e+00> : vector<16x128xf32>
    %12 = tpu.matmul %10, %11, %cst {dimension_numbers = #tpu.dot_dimension_numbers<[1], [0], [0], [1], [0, 0, 1, 1], [], []>} : vector<16x128xbf16>, vector<128x128xbf16>, vector<16x128xf32> -> vector<16x128xf32>
    %cst_6 = arith.constant 0.0333333351 : f32
    %13 = vector.broadcast %cst_6 : f32 to vector<16x128xf32>
    %14 = arith.mulf %12, %13 : vector<16x128xf32>
    %c0_7 = arith.constant 0 : index
    %c0_8 = arith.constant 0 : index
    %c0_9 = arith.constant 0 : index
    %15 = vector.load %arg5[%c0_7, %c0_8, %c0_9] : memref<1x16x128xf32, #tpu.memory_space<vmem>>, vector<1x16x128xf32>
    %16 = vector.shape_cast %15 : vector<1x16x128xf32> to vector<16x128xf32>
    %17 = vector.shape_cast %14 : vector<16x128xf32> to vector<1x16x128xf32>
    tpu.vector_store %arg5[%c0_7, %c0_8, %c0_9], %17 {strides = array<i32>} : memref<1x16x128xf32, #tpu.memory_space<vmem>>, vector<1x16x128xf32>,
    return
  }
  func.func @transform_0(%arg0: i32, %arg1: i32) -> (i32, i32) {
    %c0_i32 = arith.constant 0 : i32
    %c0_i32_0 = arith.constant 0 : i32
    %c0_i32_1 = arith.constant 0 : i32
    return %c0_i32, %c0_i32_0 : i32, i32
  }
  func.func @transform_1(%arg0: i32, %arg1: i32) -> (i32, i32, i32) {
    %c0_i32 = arith.constant 0 : i32
    %c0_i32_0 = arith.constant 0 : i32
    return %arg0, %arg1, %c0_i32 : i32, i32, i32
  }
  func.func @transform_2(%arg0: i32, %arg1: i32) -> (i32, i32, i32) {
    %c2_i32 = arith.constant 2 : i32
    %0 = arith.muli %arg1, %c2_i32 : i32
    %c1_i32 = arith.constant 1 : i32
    %1 = arith.subi %0, %c1_i32 : i32
    %c0_i32 = arith.constant 0 : i32
    %2 = arith.maxsi %1, %c0_i32 : i32
    %c0_i32_0 = arith.constant 0 : i32
    %c0_i32_1 = arith.constant 0 : i32
    return %arg0, %2, %c0_i32_0 : i32, i32, i32
  }
  func.func @transform_3(%arg0: i32, %arg1: i32) -> (i32, i32, i32) {
    %c0_i32 = arith.constant 0 : i32
    %c0_i32_0 = arith.constant 0 : i32
    return %arg0, %arg1, %c0_i32 : i32, i32, i32
  }
}

module attributes {stable_mosaic.version = 11 : i64} {
  func.func @_moblur_kernel(%arg0: i32, %arg1: i32, %arg2: memref<128x128xbf16, #tpu.memory_space<vmem>>, %arg3: memref<1x16x128xf32, #tpu.memory_space<vmem>>, %arg4: memref<1x8x128xf32, #tpu.memory_space<vmem>>, %arg5: memref<1x16x128xf32, #tpu.memory_space<vmem>>) attributes {dimension_semantics = [#tpu.dimension_semantics<parallel>, #tpu.dimension_semantics<parallel>], iteration_bounds = array<i64: 8, 1>, scalar_prefetch = 0 : i64, scratch_operands = 0 : i64, tpu.core_type = #tpu.core_type<tc>, window_params = [{pipeline_mode = #tpu.pipeline_mode<synchronous>, transform_indices = @transform_0, window_bounds = array<i64: 128, 128>}, {transform_indices = @transform_1, window_bounds = array<i64: 1, 16, 128>}, {transform_indices = @transform_2, window_bounds = array<i64: 1, 8, 128>}, {transform_indices = @transform_3, window_bounds = array<i64: 1, 16, 128>}]} {
    %c0 = arith.constant 0 : index
    %c0_0 = arith.constant 0 : index
    %c0_1 = arith.constant 0 : index
    %0 = vector.load %arg3[%c0, %c0_0, %c0_1] : memref<1x16x128xf32, #tpu.memory_space<vmem>>, vector<1x16x128xf32>
    %1 = vector.shape_cast %0 : vector<1x16x128xf32> to vector<16x128xf32>
    %c0_2 = arith.constant 0 : index
    %c7 = arith.constant 7 : index
    %c0_3 = arith.constant 0 : index
    %2 = vector.load %arg4[%c0_2, %c7, %c0_3] : memref<1x8x128xf32, #tpu.memory_space<vmem>>, vector<1x1x128xf32>
    %3 = vector.shape_cast %2 : vector<1x1x128xf32> to vector<1x128xf32>
    %c0_i32 = arith.constant 0 : i32
    %4 = arith.cmpi eq, %arg1, %c0_i32 : i32
    %5 = vector.extract_strided_slice %1 {offsets = [1, 0], sizes = [1, 128], strides = [1, 1]} : vector<16x128xf32> to vector<1x128xf32>
    %6 = arith.select %4, %5, %3 : vector<1x128xf32>
    %7 = arith.truncf %6 : vector<1x128xf32> to vector<1x128xbf16>
    %8 = vector.extract_strided_slice %1 {offsets = [0, 0], sizes = [15, 128], strides = [1, 1]} : vector<16x128xf32> to vector<15x128xf32>
    %9 = arith.truncf %8 : vector<15x128xf32> to vector<15x128xbf16>
    %10 = tpu.concatenate %7, %9 in 0 : vector<1x128xbf16>, vector<15x128xbf16> -> vector<16x128xbf16>
    %c0_4 = arith.constant 0 : index
    %c0_5 = arith.constant 0 : index
    %11 = vector.load %arg2[%c0_4, %c0_5] : memref<128x128xbf16, #tpu.memory_space<vmem>>, vector<128x128xbf16>
    %cst = arith.constant dense<0.000000e+00> : vector<16x128xf32>
    %12 = tpu.matmul %10, %11, %cst {dimension_numbers = #tpu.dot_dimension_numbers<[1], [0], [0], [1], [0, 0, 1, 1], [], []>} : vector<16x128xbf16>, vector<128x128xbf16>, vector<16x128xf32> -> vector<16x128xf32>
    %cst_6 = arith.constant 0.0333333351 : f32
    %13 = vector.broadcast %cst_6 : f32 to vector<16x128xf32>
    %14 = arith.mulf %12, %13 : vector<16x128xf32>
    %c0_7 = arith.constant 0 : index
    %c0_8 = arith.constant 0 : index
    %c0_9 = arith.constant 0 : index
    %15 = vector.load %arg5[%c0_7, %c0_8, %c0_9] : memref<1x16x128xf32, #tpu.memory_space<vmem>>, vector<1x16x128xf32>
    %16 = vector.shape_cast %15 : vector<1x16x128xf32> to vector<16x128xf32>
    %17 = vector.shape_cast %14 : vector<16x128xf32> to vector<1x16x128xf32>
    tpu.vector_store %arg5[%c0_7, %c0_8, %c0_9], %17 {strides = array<i32>} : memref<1x16x128xf32, #tpu.memory_space<vmem>>, vector<1x16x128xf32>,
    return
  }
  func.func @transform_0(%arg0: i32, %arg1: i32) -> (i32, i32) {
    %c0_i32 = arith.constant 0 : i32
    %c0_i32_0 = arith.constant 0 : i32
    %c0_i32_1 = arith.constant 0 : i32
    return %c0_i32, %c0_i32_0 : i32, i32
  }
  func.func @transform_1(%arg0: i32, %arg1: i32) -> (i32, i32, i32) {
    %c0_i32 = arith.constant 0 : i32
    %c0_i32_0 = arith.constant 0 : i32
    return %arg0, %arg1, %c0_i32 : i32, i32, i32
  }
  func.func @transform_2(%arg0: i32, %arg1: i32) -> (i32, i32, i32) {
    %c2_i32 = arith.constant 2 : i32
    %0 = arith.muli %arg1, %c2_i32 : i32
    %c1_i32 = arith.constant 1 : i32
    %1 = arith.subi %0, %c1_i32 : i32
    %c0_i32 = arith.constant 0 : i32
    %2 = arith.maxsi %1, %c0_i32 : i32
    %c0_i32_0 = arith.constant 0 : i32
    %c0_i32_1 = arith.constant 0 : i32
    return %arg0, %2, %c0_i32_0 : i32, i32, i32
  }
  func.func @transform_3(%arg0: i32, %arg1: i32) -> (i32, i32, i32) {
    %c0_i32 = arith.constant 0 : i32
    %c0_i32_0 = arith.constant 0 : i32
    return %arg0, %arg1, %c0_i32 : i32, i32, i32
  }
}

</mosaic_0001>

<bundles_post_ra>
// kernel: tpu_custom_call.1
= control target key start
LH: loop header
LB: loop body
LE: loop exit
PB: predicated region body
PF: predicated region fallthrough
CT: control target
= control target key end

     0   :  { %s1180_s0 = inlined_call_operand.hbm [shape: bf16[128,128], index: 0, kind: input, shape index: {}]   ;;  %s1181_s1 = inlined_call_operand.hbm [shape: f32[8,16,128], index: 1, kind: input, shape index: {}]   ;;  %s1182_s2 = inlined_call_operand.hbm [shape: f32[8,16,128], index: 2, kind: input, shape index: {}]   ;;  %s1183_s3 = inlined_call_operand.hbm [shape: f32[8,16,128], index: 3, kind: output, shape index: {}]  }
   0x1   :  { %1192 = sst [smem:[#allocation13_spill]] %s1181_s1 }
   0x2   :  { %8 = vsyncpa [#allocation3], 0 }
   0x3   :  { %9 = vsyncpa [#allocation6], 0 }
   0x4   :  { %11 = vsyncpa [#allocation6 + $0x1], 0 }
   0x5   :  { %12 = vsyncpa [#allocation4], 0 }
   0x6   :  { %14 = vsyncpa [#allocation4 + $0x1], 0  ;;  %s917_s12 = smov 0   ;;  %s919_s13 = smov 0  }
   0x7   :  { %s921_s14 = smov 0   ;;  %s923_s15 = smov 0  }
   0x8   :  { %s925_s16 = smov 0   ;;  %s927_s17 = smov 0  }
   0x9 LB: > { %s32_s18 = sadd.s32 1, %s879_s16  ;;  %s62_s19 = sadd.s32 1, %s871_s14  ;;  %s883_s17 = sphi %s927_s17, %s20_s17   ;;  %s879_s16 = sphi %s925_s16, %s1215_s16   ;;  %s875_s15 = sphi %s923_s15, %s1214_s15   ;;  %s871_s14 = sphi %s921_s14, %s1213_s14   ;;  %s867_s13 = sphi %s919_s13, %s1212_s13   ;;  %s863_s12 = sphi %s917_s12, %s1211_s12  }
   0xa   : > { %p34_p0 = scmp.ge.s32.totalorder %s32_s18, 8  ;;  %p69_p1 = scmp.ne.s32.totalorder %s871_s14, %s867_s13 }
   0xb   : > { %p70_p2 = scmp.eq.s32.totalorder %s883_s17, 0  ;;  %p641_p4 = scmp.lt.s32.totalorder %s883_s17, 8 }
   0xc   : > { %s1217_s18 = smov (%p34_p0, %s32_s18), 0  ;;  %s176_s21 = sand.u32 1, %s883_s17  }
   0xd   : > { %1193 = sst [smem:[#allocation12_spill]] %s1217_s18  ;;  %p71_p3 = por %p70_p2, %p69_p1 }
   0xe   : > { %s57_s20 = ssub.s32 %s879_s16, %s1217_s18  ;;  %s178_s22 = sand.u32 1, %s871_s14  }
   0xf   : > { %p60_p5 = scmp.eq.s32.totalorder %s57_s20, 0  ;;  %s583_s23 = sshll.u32 %s879_s16, 8 }
  0x10   : > { %s559_s25 = sshll.u32 %s178_s22, 4  ;;  %s1194_s1 = sld [smem:[#allocation13_spill]] }
  0x11   : > { %s964_s24 = scalar_select %p60_p5, %s871_s14, %s62_s19  }
  0x12   : > { %p975_p6 = pnand %p641_p4, %p71_p3  ;;  %s180_s30 = scalar_lea.vmem [#allocation5], %s559_s25 }
  0x13   : > { %s189_s4 = sshll.u32 %s180_s30, 4  ;;  %s981_s5 = scalar_lea.sflag [#allocation6], %s176_s21  ;;  %s979_s4 = int_to_ptr.vmem [resolvable:$true] %s189_s4 }
  0x14   : > { %s1195_s29 = scalar_select %p975_p6, 1, 0 }
  0x15   : > { %p1186_p8 = pneg %p975_p6 }
  0x16   : > { %s973_s28 = scalar_lea.hbm %s1194_s1, %s583_s23  ;;  %s714_s9 = scalar_lea.hbm %s1194_s1, 2048 }
  0x17   : > { %s709_s6 = scalar_lea.hbm %s973_s28, 256  ;;  %p715_p11 = scmp.lt.u32.totalorder %s973_s28, %s1194_s1 }
  0x18   : > { %p710_p7 = scmp.ne.s32.totalorder %s973_s28, %s709_s6  ;;  %p716_p12 = scmp.lt.u32.totalorder %s714_s9, %s709_s6 }
  0x19   : > { %p718_p0 = scmp.lt.u32.totalorder %s709_s6, %s973_s28 }
  0x1a   : > { %p712_p9 = pnand %p1186_p8, %p710_p7  ;;  %p717_p13 = por %p716_p12, %p715_p11 }
  0x1c   : > { %p713_p10 = pneg %p712_p9  ;;  %p719_p2 = por %p718_p0, %p717_p13 }
  0x1e   : > { %p720_p3 = pnand %p719_p2, %p713_p10 }
  0x20   : > { %723 = shalt.err (!%p720_p3)
}
  0x21   : > { %s724_s19 = scalar_lea.vmem %s979_s4, 256  ;;  %s885_s20 = smov [#allocation5]  }
  0x22   : > { %p725_p4 = scmp.ne.s32.totalorder %s979_s4, %s724_s19  ;;  %s729_s21 = sshll.u32 %s885_s20, 4  ;;  %s730_s21 = int_to_ptr.vmem [resolvable:$false] %s729_s21 }
  0x23   : > { %s731_s25 = scalar_lea.vmem %s730_s21, 512  ;;  %p732_p9 = scmp.lt.s32.totalorder %s979_s4, %s730_s21 }
  0x24   : > { %p727_p5 = pnand %p725_p4, %p1186_p8  ;;  %p733_p11 = scmp.lt.s32.totalorder %s731_s25, %s724_s19 }
  0x26   : > { %p728_p7 = pneg %p727_p5  ;;  %p734_p12 = por %p733_p11, %p732_p9 }
  0x28   : > { %p735_p13 = pnand %p734_p12, %p728_p7 }
  0x2a   : > { %738 = shalt.err (!%p735_p13)
}
  0x2b   : > { %s886_s26 = smov 128   ;;  %s887_s27 = smov 8  }
  0x2c   : > { %632 = dma.hbm_to_vmem [thread:$0]  (!%p975_p6), %s973_s28, 256, %s979_s4, %s981_s5, %s886_s26, %s886_s26, %s887_s27  }
  0x2d   : > { %s1010_s30 = sadd.s32 4294967295, %s883_s17   ;;  %s555_s6 = sadd.s32 4294967294, %s883_s17  }
  0x2e   : > { %p75_p10 = scmp.ne.s32.totalorder %s867_s13, %s863_s12  ;;  %p1185_p0 = scmp.eq.s32.totalorder %s1010_s30, 0 }
  0x2f   : > { %p137_p2 = scmp.eq.s32.totalorder %s1010_s30, 7  ;;  %p143_p3 = scmp.eq.s32.totalorder %s555_s6, 7 }
  0x30   : > { %p556_p4 = scmp.ge.s32.totalorder %s883_s17, 1  ;;  %p1020_p5 = por %p1185_p0, %p75_p10 }
  0x31   : > { %p1027_p7 = por %p137_p2, %p69_p1  ;;  %p1031_p9 = por %p143_p3, %p75_p10 }
  0x32   : > { %s1196_s7 = scalar_select %p1020_p5, 1, 0 }
  0x33   : > { %s1197_s28 = scalar_select %p1027_p7, 1, 0 }
  0x34   : > { %s1198_s4 = scalar_select %p1031_p9, 1, 0 }
  0x35   : > { %p150_p11 = scmp.lt.s32.totalorder %s883_s17, 9  ;;  %s888_s9 = smov [#allocation2]  }
  0x36   : > { %s162_s10 = sshll.u32 %s888_s9, 4  ;;  %s562_s11 = sshll.u32 %s178_s22, 3  ;;  %s1040_s10 = int_to_ptr.vmem [resolvable:$true] %s162_s10 }
  0x37   : > { %p1036_p12 = pnand %p556_p4, %p150_p11  ;;  %s1057_s25 = scalar_lea.hbm %s1182_s2, %s583_s23 }
  0x38   : > { %s203_s26 = scalar_lea.vmem [#allocation7], %s562_s11  ;;  %s739_s22 = scalar_lea.hbm %s1180_s0, 1024 }
  0x39   : > { %s1199_s8 = scalar_select %p1036_p12, 1, 0 }
  0x3a   : > { %p625_p13 = pneg %p1036_p12  ;;  %s216_s27 = sshll.u32 %s203_s26, 4  ;;  %s1059_s27 = int_to_ptr.vmem [resolvable:$true] %s216_s27 }
  0x3b   : > { %p740_p10 = scmp.ne.s32.totalorder %s1180_s0, %s739_s22  ;;  %p746_p11 = scmp.lt.u32.totalorder %s739_s22, %s1180_s0 }
  0x3c   : > { %p1048_p1 = pnand %p625_p13, %p1185_p0 }
  0x3e   : > { %p741_p2 = pneg %p1048_p1 }
  0x40   : > { %p742_p3 = pnand %p741_p2, %p740_p10 }
  0x42   : > { %p743_p4 = pneg %p742_p3 }
  0x44   : > { %p748_p13 = pnand %p746_p11, %p743_p4 }
  0x46   : > { %751 = shalt.err (!%p748_p13)
}
  0x47   : > { %s752_s23 = scalar_lea.vmem %s1040_s10, 1024  ;;  %p760_p7 = scmp.lt.s32.totalorder %s1040_s10, %s1040_s10 }
  0x48   : > { %p753_p0 = scmp.ne.s32.totalorder %s1040_s10, %s752_s23  ;;  %p761_p5 = scmp.lt.s32.totalorder %s752_s23, %s752_s23 }
  0x4a   : > { %p755_p8 = pnand %p753_p0, %p741_p2  ;;  %p762_p12 = por %p761_p5, %p760_p7 }
  0x4c   : > { %p756_p9 = pneg %p755_p8 }
  0x4e   : > { %p763_p6 = pnand %p762_p12, %p756_p9 }
  0x50   : > { %766 = shalt.err (!%p763_p6)
}
  0x51   : > { %s889_s1 = smov 64   ;;  %s890_s18 = smov 4  }
  0x52   : > { %628 = dma.hbm_to_vmem [thread:$0]  (!%p1048_p1), %s1180_s0, 1024, %s1040_s10, [#allocation3], %s889_s1, %s889_s1, %s890_s18  }
  0x53   : > { %s767_s6 = scalar_lea.hbm %s1057_s25, 128  ;;  %p1201_p0 = scmp.ne.s32.totalorder %s1195_s29, 0 }
  0x54   : > { %p768_p8 = scmp.ne.s32.totalorder %s1057_s25, %s767_s6  ;;  %s772_s20 = scalar_lea.hbm %s1182_s2, 2048 }
  0x55   : > { %p1202_p5 = pneg %p1201_p0  ;;  %p773_p9 = scmp.lt.u32.totalorder %s1057_s25, %s1182_s2 }
  0x56   : > { %p774_p12 = scmp.lt.u32.totalorder %s772_s20, %s767_s6  ;;  %p776_p2 = scmp.lt.u32.totalorder %s767_s6, %s1057_s25 }
  0x57   : > { %p770_p7 = pnand %p768_p8, %p1202_p5 }
  0x58   : > { %p775_p10 = por %p774_p12, %p773_p9 }
  0x59   : > { %p771_p6 = pneg %p770_p7 }
  0x5a   : > { %p777_p3 = por %p776_p2, %p775_p10 }
  0x5c   : > { %p778_p4 = pnand %p777_p3, %p771_p6 }
  0x5e   : > { %781 = shalt.err (!%p778_p4)
}
  0x5f   : > { %s782_s10 = scalar_lea.vmem %s1059_s27, 128  ;;  %p1203_p11 = pmov %p1202_p5 }
  0x60   : > { %p783_p1 = scmp.ne.s32.totalorder %s1059_s27, %s782_s10  ;;  %s891_s19 = smov [#allocation7]  }
  0x61   : > { %s787_s1 = sshll.u32 %s891_s19, 4  ;;  %s788_s1 = int_to_ptr.vmem [resolvable:$false] %s787_s1 }
  0x62   : > { %p785_p13 = pnand %p783_p1, %p1203_p11  ;;  %s789_s18 = scalar_lea.vmem %s788_s1, 256 }
  0x63   : > { %p790_p5 = scmp.lt.s32.totalorder %s1059_s27, %s788_s1  ;;  %p791_p7 = scmp.lt.s32.totalorder %s789_s18, %s782_s10 }
  0x64   : > { %p786_p8 = pneg %p785_p13 }
  0x65   : > { %p792_p9 = por %p791_p7, %p790_p5 }
  0x67   : > { %p793_p12 = pnand %p792_p9, %p786_p8 }
  0x69   : > { %796 = shalt.err (!%p793_p12)
}
  0x6a   : > { %635 = dma.hbm_to_vmem [thread:$0]  (!%p1201_p0), %s1057_s25, 128, %s1059_s27, %s981_s5  }
  0x6b   : > { %p1204_p6 = scmp.ne.s32.totalorder %s1199_s8, 0 }
  0x6c   : > { %p1205_p10 = scmp.eq.s32.totalorder (!%p1204_p6), %s1010_s30, 0 }
  0x6d   : > { %225 = sbr.rel (%p1204_p6) target bundleno = 386 (0x182), region = 32 }
  0x74   : > { %850 = dma.done.wait (%p1205_p10), [#allocation3], 1024   ;;  %p1206_p2 = pmov %p1205_p10 }
  0x75   : > { %s231_s11 = sand.u32 1, %s1010_s30   ;;  %s233_s26 = sand.u32 1, %s867_s13  }
  0x76   : > { %852 = vsyncadd (%p1206_p2), [#allocation3], 4294966272  ;;  %s1116_s29 = sshll.u32 %s233_s26, 4  ;;  %s232_s5 = scalar_lea.sflag [#allocation6], %s231_s11 }
  0x77   : > { %s235_s25 = scalar_lea.vmem [#allocation5], %s1116_s29  ;;  %p1207_p0 = scmp.ne.s32.totalorder %s1196_s7, 0 }
  0x79   : > { %854 = dma.done.wait (%p1207_p0), %s232_s5, 384  }
  0x7a   : > { %856 = vsyncadd (%p1207_p0), %s232_s5, 4294966912  ;;  %v892_v0 = vmov 0.0   ;;  %vm893_vm0 = vmmov 0   ;;  %v701_v1 = vld [vmem:[#allocation2] sm:$0xff]   ;;  %v702_v2 = vld [vmem:[#allocation2 + $0x8] sm:$0xff]   ;;  %vm304_vm1 = vcmask 1040384  }
  0x7b   : > { %595 = vmatprep.subr.bf16.mxu0 %v892_v0  ;;  %611 = vmatprep.mubr.msk.bf16.mxu0 %vm893_vm0, %v892_v0  ;;  %v703_v3 = vld [vmem:[#allocation2 + $0x10] sm:$0xff]   ;;  %v704_v4 = vld [vmem:[#allocation2 + $0x18] sm:$0xff]   ;;  %v705_v7 = vld [vmem:[#allocation2 + $0x20] sm:$0xff]   ;;  %vm305_vm2 = vsmask.f32 256  ;;  %s271_s30 = scalar_lea.vmem [#allocation8], %s1116_s29 }
  0x7c   : > { %596 = vmatpush3.bf16.msra.mxu0 %v701_v1  ;;  %v279_v5 = vld [vmem:[%s235_s25] sm:$0xff]  ;;  %v280_v6 = vld [vmem:[%s235_s25 + $0x8] sm:$0xff]  ;;  %vm306_vm3 = vmand %vm304_vm1, %vm305_vm2  ;;  %s433_s7 = sshll.u32 %s271_s30, 4  ;;  %s585_s8 = sshll.u32 %s875_s15, 8  ;;  %s1125_s7 = int_to_ptr.vmem [resolvable:$true] %s433_s7 }
  0x7d   : > { %597 = vmatprep.subr.bf16.mxu0 %v892_v0  ;;  %v291_v8 = vpack.c.bf16 %v280_v6, %v279_v5  ;;  %v706_v9 = vld [vmem:[#allocation2 + $0x28] sm:$0xff]   ;;  %v707_v11 = vld [vmem:[#allocation2 + $0x30] sm:$0xff]   ;;  %v290_v12 = vpack.c.bf16 %v279_v5, %v279_v5  ;;  %v708_v15 = vld [vmem:[#allocation2 + $0x38] sm:$0xff]   ;;  %s1130_s9 = scalar_lea.hbm %s1183_s3, %s585_s8  ;;  %s1134_s15 = scalar_lea.sflag [#allocation4], %s233_s26 }
  0x7e   : > { %s797_s22 = scalar_lea.vmem %s1125_s7, 256  ;;  %p1208_p4 = scmp.ne.s32.totalorder %s1197_s28, 0 }
  0x7f   : > { %v297_v10 = vshrl.u32 %v291_v8, 16  ;;  %v300_v14 = vshll.u32 %v291_v8, 16  ;;  %v293_v16 = vshrl.u32 %v290_v12, 16  ;;  %p798_p3 = scmp.ne.s32.totalorder %s1125_s7, %s797_s22  ;;  %s894_s20 = smov [#allocation8]  }
  0x80   : > { %598 = vmatpush3.bf16.msra.mxu0 %v702_v2  ;;  %s801_s21 = sshll.u32 %s894_s20, 4  ;;  %s802_s21 = int_to_ptr.vmem [resolvable:$false] %s801_s21 }
  0x81   : > { %599 = vmatprep.subr.bf16.mxu0 %v892_v0  ;;  %v299_v13 = vrot.slane %v297_v10, 7  ;;  %p799_p1 = pnand %p798_p3, %p1208_p4  ;;  %s803_s23 = scalar_lea.vmem %s802_s21, 512 }
  0x82   : > { %p804_p13 = scmp.lt.s32.totalorder %s1125_s7, %s802_s21  ;;  %p805_p8 = scmp.lt.s32.totalorder %s803_s23, %s797_s22 }
  0x83   : > { %v302_v17 = vor.u32 %v300_v14, %v299_v13  ;;  %p800_p11 = pneg %p799_p1 }
  0x84   : > { %600 = vmatpush3.bf16.msra.mxu0 %v703_v3  ;;  %p806_p5 = por %p805_p8, %p804_p13 }
  0x85   : > { %601 = vmatprep.subr.bf16.mxu0 %v892_v0  ;;  %v307_v18 = vsel %vm306_vm3, %v293_v16, %v302_v17 }
  0x86   : > { %p807_p7 = pnand %p806_p5, %p800_p11 }
  0x88   : > { %602 = vmatpush3.bf16.msra.mxu0 %v704_v4 }
  0x89   : > { %603 = vmatprep.subr.bf16.mxu0 %v892_v0 }
  0x8c   : > { %604 = vmatpush3.bf16.msra.mxu0 %v705_v7 }
  0x8d   : > { %605 = vmatprep.subr.bf16.mxu0 %v892_v0 }
  0x90   : > { %606 = vmatpush3.bf16.msra.mxu0 %v706_v9 }
  0x91   : > { %607 = vmatprep.subr.bf16.mxu0 %v892_v0 }
  0x94   : > { %608 = vmatpush3.bf16.msra.mxu0 %v707_v11 }
  0x95   : > { %609 = vmatprep.subr.bf16.mxu0 %v892_v0 }
  0x98   : > { %610 = vmatpush3.bf16.msra.mxu0 %v708_v15 }
  0x9b   : > { %612 = vmatmul.mubr.bf16.vlgmr.msra.gmra.mrb[0].mxu0 %v307_v18 }
 0x16e   : > { %v406_v19 = vpop.f32.mrb[0].mxu0 }
 0x16f   : > { %v413_v20 = vmul.f32 0.033333335, %v406_v19  ;;  %v613_v21 = vpop.f32.mrb[1].mxu0 }
 0x170   : > { %v409_v22 = vpop.f32.mrb[2].mxu0 }
 0x171   : > { %415 = vst [vmem:[%s271_s30] sm:$0xff] %v413_v20  ;;  %v414_v23 = vmul.f32 0.033333335, %v409_v22  ;;  %v614_v24 = vpop.f32.mrb[3].mxu0 }
 0x173   : > { %416 = vst [vmem:[%s271_s30 + $0x8] sm:$0xff] %v414_v23 }
 0x174   : > { %810 = shalt.err (!%p807_p7)
}
 0x175   : > { %s811_s10 = scalar_lea.hbm %s1130_s9, 256  ;;  %s815_s18 = scalar_lea.hbm %s1183_s3, 2048 }
 0x176   : > { %p812_p9 = scmp.ne.s32.totalorder %s1130_s9, %s811_s10  ;;  %p816_p10 = scmp.lt.u32.totalorder %s1130_s9, %s1183_s3 }
 0x177   : > { %p817_p2 = scmp.lt.u32.totalorder %s815_s18, %s811_s10  ;;  %p819_p3 = scmp.lt.u32.totalorder %s811_s10, %s1130_s9 }
 0x178   : > { %p813_p12 = pnand %p812_p9, %p1208_p4 }
 0x179   : > { %p818_p0 = por %p817_p2, %p816_p10 }
 0x17a   : > { %p814_p6 = pneg %p813_p12 }
 0x17b   : > { %p820_p1 = por %p819_p3, %p818_p0 }
 0x17d   : > { %p821_p11 = pnand %p820_p1, %p814_p6 }
 0x17f   : > { %824 = shalt.err (!%p821_p11)
}
 0x180   : > { %s895_s29 = smov 128   ;;  %s896_s5 = smov 8  }
 0x181   : > { %623 = dma.vmem_to_hbm [thread:$0]  (%p1208_p4), %s1125_s7, 256, %s1130_s9, %s1134_s15, %s895_s29, %s895_s29, %s896_s5  }
 0x182 PF: > { %p643_p13 = scmp.ge.s32.totalorder %s883_s17, 2  ;;  %s448_s25 = sand.u32 1, %s863_s12  }
 0x183   : > { %p1209_p8 = scmp.ne.s32.totalorder %s1198_s4, 0  ;;  %s449_s30 = scalar_lea.sflag [#allocation4], %s448_s25 }
 0x185   : > { %p637_p5 = pnand %p643_p13, %p1209_p8 }
 0x187   : > { %858 = dma.done.wait (!%p637_p5), %s449_s30, 256  }
 0x188   : > { %860 = vsyncadd (!%p637_p5), %s449_s30, 4294967040  ;;  %s20_s17 = sadd.s32 1, %s883_s17   ;;  %s1210_s28 = sld [smem:[#allocation12_spill]] }
 0x189   : > { %p17_p7 = scmp.ge.s32.totalorder %s20_s17, 10   ;;  %s1211_s12 = smov %s867_s13 }
 0x18a   : > { %s1212_s13 = smov %s871_s14  ;;  %s1213_s14 = smov %s964_s24 }
 0x18b   : > { %s1214_s15 = smov %s879_s16  ;;  %19 = sbr.rel (!%p17_p7) target bundleno = 9 (0x9), region = 93 }
 0x18e   : > { %s1215_s16 = smov %s1210_s28 }
 0x192   :  { %454 = vsyncpa [#allocation3], 1 }
 0x193   :  { %456 = vsyncpa [#allocation3 + $0x1], 1 }
 0x194   :  { %457 = vsyncpa [#allocation6], 1 }
 0x195   :  { %459 = vsyncpa [#allocation6 + $0x1], 1 }
 0x196   :  { %460 = vsyncpa [#allocation4], 1 }
 0x197   :  { %462 = vsyncpa [#allocation4 + $0x1], 1 }

// kernel: tpu_custom_call.1
= control target key start
LH: loop header
LB: loop body
LE: loop exit
PB: predicated region body
PF: predicated region fallthrough
CT: control target
= control target key end

     0   :  { %s1180_s0 = inlined_call_operand.hbm [shape: bf16[128,128], index: 0, kind: input, shape index: {}]   ;;  %s1181_s1 = inlined_call_operand.hbm [shape: f32[8,16,128], index: 1, kind: input, shape index: {}]   ;;  %s1182_s2 = inlined_call_operand.hbm [shape: f32[8,16,128], index: 2, kind: input, shape index: {}]   ;;  %s1183_s3 = inlined_call_operand.hbm [shape: f32[8,16,128], index: 3, kind: output, shape index: {}]  }
   0x1   :  { %1192 = sst [smem:[#allocation13_spill]] %s1181_s1 }
   0x2   :  { %8 = vsyncpa [#allocation3], 0 }
   0x3   :  { %9 = vsyncpa [#allocation6], 0 }
   0x4   :  { %11 = vsyncpa [#allocation6 + $0x1], 0 }
   0x5   :  { %12 = vsyncpa [#allocation4], 0 }
   0x6   :  { %14 = vsyncpa [#allocation4 + $0x1], 0  ;;  %s917_s12 = smov 0   ;;  %s919_s13 = smov 0  }
   0x7   :  { %s921_s14 = smov 0   ;;  %s923_s15 = smov 0  }
   0x8   :  { %s925_s16 = smov 0   ;;  %s927_s17 = smov 0  }
   0x9 LB: > { %s32_s18 = sadd.s32 1, %s879_s16  ;;  %s62_s19 = sadd.s32 1, %s871_s14  ;;  %s883_s17 = sphi %s927_s17, %s20_s17   ;;  %s879_s16 = sphi %s925_s16, %s1215_s16   ;;  %s875_s15 = sphi %s923_s15, %s1214_s15   ;;  %s871_s14 = sphi %s921_s14, %s1213_s14   ;;  %s867_s13 = sphi %s919_s13, %s1212_s13   ;;  %s863_s12 = sphi %s917_s12, %s1211_s12  }
   0xa   : > { %p34_p0 = scmp.ge.s32.totalorder %s32_s18, 8  ;;  %p69_p1 = scmp.ne.s32.totalorder %s871_s14, %s867_s13 }
   0xb   : > { %p70_p2 = scmp.eq.s32.totalorder %s883_s17, 0  ;;  %p641_p4 = scmp.lt.s32.totalorder %s883_s17, 8 }
   0xc   : > { %s1217_s18 = smov (%p34_p0, %s32_s18), 0  ;;  %s176_s21 = sand.u32 1, %s883_s17  }
   0xd   : > { %1193 = sst [smem:[#allocation12_spill]] %s1217_s18  ;;  %p71_p3 = por %p70_p2, %p69_p1 }
   0xe   : > { %s57_s20 = ssub.s32 %s879_s16, %s1217_s18  ;;  %s178_s22 = sand.u32 1, %s871_s14  }
   0xf   : > { %p60_p5 = scmp.eq.s32.totalorder %s57_s20, 0  ;;  %s583_s23 = sshll.u32 %s879_s16, 8 }
  0x10   : > { %s559_s25 = sshll.u32 %s178_s22, 4  ;;  %s1194_s1 = sld [smem:[#allocation13_spill]] }
  0x11   : > { %s964_s24 = scalar_select %p60_p5, %s871_s14, %s62_s19  }
  0x12   : > { %p975_p6 = pnand %p641_p4, %p71_p3  ;;  %s180_s30 = scalar_lea.vmem [#allocation5], %s559_s25 }
  0x13   : > { %s189_s4 = sshll.u32 %s180_s30, 4  ;;  %s981_s5 = scalar_lea.sflag [#allocation6], %s176_s21  ;;  %s979_s4 = int_to_ptr.vmem [resolvable:$true] %s189_s4 }
  0x14   : > { %s1195_s29 = scalar_select %p975_p6, 1, 0 }
  0x15   : > { %p1186_p8 = pneg %p975_p6 }
  0x16   : > { %s973_s28 = scalar_lea.hbm %s1194_s1, %s583_s23  ;;  %s714_s9 = scalar_lea.hbm %s1194_s1, 2048 }
  0x17   : > { %s709_s6 = scalar_lea.hbm %s973_s28, 256  ;;  %p715_p11 = scmp.lt.u32.totalorder %s973_s28, %s1194_s1 }
  0x18   : > { %p710_p7 = scmp.ne.s32.totalorder %s973_s28, %s709_s6  ;;  %p716_p12 = scmp.lt.u32.totalorder %s714_s9, %s709_s6 }
  0x19   : > { %p718_p0 = scmp.lt.u32.totalorder %s709_s6, %s973_s28 }
  0x1a   : > { %p712_p9 = pnand %p1186_p8, %p710_p7  ;;  %p717_p13 = por %p716_p12, %p715_p11 }
  0x1c   : > { %p713_p10 = pneg %p712_p9  ;;  %p719_p2 = por %p718_p0, %p717_p13 }
  0x1e   : > { %p720_p3 = pnand %p719_p2, %p713_p10 }
  0x20   : > { %723 = shalt.err (!%p720_p3)
}
  0x21   : > { %s724_s19 = scalar_lea.vmem %s979_s4, 256  ;;  %s885_s20 = smov [#allocation5]  }
  0x22   : > { %p725_p4 = scmp.ne.s32.totalorder %s979_s4, %s724_s19  ;;  %s729_s21 = sshll.u32 %s885_s20, 4  ;;  %s730_s21 = int_to_ptr.vmem [resolvable:$false] %s729_s21 }
  0x23   : > { %s731_s25 = scalar_lea.vmem %s730_s21, 512  ;;  %p732_p9 = scmp.lt.s32.totalorder %s979_s4, %s730_s21 }
  0x24   : > { %p727_p5 = pnand %p725_p4, %p1186_p8  ;;  %p733_p11 = scmp.lt.s32.totalorder %s731_s25, %s724_s19 }
  0x26   : > { %p728_p7 = pneg %p727_p5  ;;  %p734_p12 = por %p733_p11, %p732_p9 }
  0x28   : > { %p735_p13 = pnand %p734_p12, %p728_p7 }
  0x2a   : > { %738 = shalt.err (!%p735_p13)
}
  0x2b   : > { %s886_s26 = smov 128   ;;  %s887_s27 = smov 8  }
  0x2c   : > { %632 = dma.hbm_to_vmem [thread:$0]  (!%p975_p6), %s973_s28, 256, %s979_s4, %s981_s5, %s886_s26, %s886_s26, %s887_s27  }
  0x2d   : > { %s1010_s30 = sadd.s32 4294967295, %s883_s17   ;;  %s555_s6 = sadd.s32 4294967294, %s883_s17  }
  0x2e   : > { %p75_p10 = scmp.ne.s32.totalorder %s867_s13, %s863_s12  ;;  %p1185_p0 = scmp.eq.s32.totalorder %s1010_s30, 0 }
  0x2f   : > { %p137_p2 = scmp.eq.s32.totalorder %s1010_s30, 7  ;;  %p143_p3 = scmp.eq.s32.totalorder %s555_s6, 7 }
  0x30   : > { %p556_p4 = scmp.ge.s32.totalorder %s883_s17, 1  ;;  %p1020_p5 = por %p1185_p0, %p75_p10 }
  0x31   : > { %p1027_p7 = por %p137_p2, %p69_p1  ;;  %p1031_p9 = por %p143_p3, %p75_p10 }
  0x32   : > { %s1196_s7 = scalar_select %p1020_p5, 1, 0 }
  0x33   : > { %s1197_s28 = scalar_select %p1027_p7, 1, 0 }
  0x34   : > { %s1198_s4 = scalar_select %p1031_p9, 1, 0 }
  0x35   : > { %p150_p11 = scmp.lt.s32.totalorder %s883_s17, 9  ;;  %s888_s9 = smov [#allocation2]  }
  0x36   : > { %s162_s10 = sshll.u32 %s888_s9, 4  ;;  %s562_s11 = sshll.u32 %s178_s22, 3  ;;  %s1040_s10 = int_to_ptr.vmem [resolvable:$true] %s162_s10 }
  0x37   : > { %p1036_p12 = pnand %p556_p4, %p150_p11  ;;  %s1057_s25 = scalar_lea.hbm %s1182_s2, %s583_s23 }
  0x38   : > { %s203_s26 = scalar_lea.vmem [#allocation7], %s562_s11  ;;  %s739_s22 = scalar_lea.hbm %s1180_s0, 1024 }
  0x39   : > { %s1199_s8 = scalar_select %p1036_p12, 1, 0 }
  0x3a   : > { %p625_p13 = pneg %p1036_p12  ;;  %s216_s27 = sshll.u32 %s203_s26, 4  ;;  %s1059_s27 = int_to_ptr.vmem [resolvable:$true] %s216_s27 }
  0x3b   : > { %p740_p10 = scmp.ne.s32.totalorder %s1180_s0, %s739_s22  ;;  %p746_p11 = scmp.lt.u32.totalorder %s739_s22, %s1180_s0 }
  0x3c   : > { %p1048_p1 = pnand %p625_p13, %p1185_p0 }
  0x3e   : > { %p741_p2 = pneg %p1048_p1 }
  0x40   : > { %p742_p3 = pnand %p741_p2, %p740_p10 }
  0x42   : > { %p743_p4 = pneg %p742_p3 }
  0x44   : > { %p748_p13 = pnand %p746_p11, %p743_p4 }
  0x46   : > { %751 = shalt.err (!%p748_p13)
}
  0x47   : > { %s752_s23 = scalar_lea.vmem %s1040_s10, 1024  ;;  %p760_p7 = scmp.lt.s32.totalorder %s1040_s10, %s1040_s10 }
  0x48   : > { %p753_p0 = scmp.ne.s32.totalorder %s1040_s10, %s752_s23  ;;  %p761_p5 = scmp.lt.s32.totalorder %s752_s23, %s752_s23 }
  0x4a   : > { %p755_p8 = pnand %p753_p0, %p741_p2  ;;  %p762_p12 = por %p761_p5, %p760_p7 }
  0x4c   : > { %p756_p9 = pneg %p755_p8 }
  0x4e   : > { %p763_p6 = pnand %p762_p12, %p756_p9 }
  0x50   : > { %766 = shalt.err (!%p763_p6)
}
  0x51   : > { %s889_s1 = smov 64   ;;  %s890_s18 = smov 4  }
  0x52   : > { %628 = dma.hbm_to_vmem [thread:$0]  (!%p1048_p1), %s1180_s0, 1024, %s1040_s10, [#allocation3], %s889_s1, %s889_s1, %s890_s18  }
  0x53   : > { %s767_s6 = scalar_lea.hbm %s1057_s25, 128  ;;  %p1201_p0 = scmp.ne.s32.totalorder %s1195_s29, 0 }
  0x54   : > { %p768_p8 = scmp.ne.s32.totalorder %s1057_s25, %s767_s6  ;;  %s772_s20 = scalar_lea.hbm %s1182_s2, 2048 }
  0x55   : > { %p1202_p5 = pneg %p1201_p0  ;;  %p773_p9 = scmp.lt.u32.totalorder %s1057_s25, %s1182_s2 }
  0x56   : > { %p774_p12 = scmp.lt.u32.totalorder %s772_s20, %s767_s6  ;;  %p776_p2 = scmp.lt.u32.totalorder %s767_s6, %s1057_s25 }
  0x57   : > { %p770_p7 = pnand %p768_p8, %p1202_p5 }
  0x58   : > { %p775_p10 = por %p774_p12, %p773_p9 }
  0x59   : > { %p771_p6 = pneg %p770_p7 }
  0x5a   : > { %p777_p3 = por %p776_p2, %p775_p10 }
  0x5c   : > { %p778_p4 = pnand %p777_p3, %p771_p6 }
  0x5e   : > { %781 = shalt.err (!%p778_p4)
}
  0x5f   : > { %s782_s10 = scalar_lea.vmem %s1059_s27, 128  ;;  %p1203_p11 = pmov %p1202_p5 }
  0x60   : > { %p783_p1 = scmp.ne.s32.totalorder %s1059_s27, %s782_s10  ;;  %s891_s19 = smov [#allocation7]  }
  0x61   : > { %s787_s1 = sshll.u32 %s891_s19, 4  ;;  %s788_s1 = int_to_ptr.vmem [resolvable:$false] %s787_s1 }
  0x62   : > { %p785_p13 = pnand %p783_p1, %p1203_p11  ;;  %s789_s18 = scalar_lea.vmem %s788_s1, 256 }
  0x63   : > { %p790_p5 = scmp.lt.s32.totalorder %s1059_s27, %s788_s1  ;;  %p791_p7 = scmp.lt.s32.totalorder %s789_s18, %s782_s10 }
  0x64   : > { %p786_p8 = pneg %p785_p13 }
  0x65   : > { %p792_p9 = por %p791_p7, %p790_p5 }
  0x67   : > { %p793_p12 = pnand %p792_p9, %p786_p8 }
  0x69   : > { %796 = shalt.err (!%p793_p12)
}
  0x6a   : > { %635 = dma.hbm_to_vmem [thread:$0]  (!%p1201_p0), %s1057_s25, 128, %s1059_s27, %s981_s5  }
  0x6b   : > { %p1204_p6 = scmp.ne.s32.totalorder %s1199_s8, 0 }
  0x6c   : > { %p1205_p10 = scmp.eq.s32.totalorder (!%p1204_p6), %s1010_s30, 0 }
  0x6d   : > { %225 = sbr.rel (%p1204_p6) target bundleno = 386 (0x182), region = 32 }
  0x74   : > { %850 = dma.done.wait (%p1205_p10), [#allocation3], 1024   ;;  %p1206_p2 = pmov %p1205_p10 }
  0x75   : > { %s231_s11 = sand.u32 1, %s1010_s30   ;;  %s233_s26 = sand.u32 1, %s867_s13  }
  0x76   : > { %852 = vsyncadd (%p1206_p2), [#allocation3], 4294966272  ;;  %s1116_s29 = sshll.u32 %s233_s26, 4  ;;  %s232_s5 = scalar_lea.sflag [#allocation6], %s231_s11 }
  0x77   : > { %s235_s25 = scalar_lea.vmem [#allocation5], %s1116_s29  ;;  %p1207_p0 = scmp.ne.s32.totalorder %s1196_s7, 0 }
  0x79   : > { %854 = dma.done.wait (%p1207_p0), %s232_s5, 384  }
  0x7a   : > { %856 = vsyncadd (%p1207_p0), %s232_s5, 4294966912  ;;  %v892_v0 = vmov 0.0   ;;  %vm893_vm0 = vmmov 0   ;;  %v701_v1 = vld [vmem:[#allocation2] sm:$0xff]   ;;  %v702_v2 = vld [vmem:[#allocation2 + $0x8] sm:$0xff]   ;;  %vm304_vm1 = vcmask 1040384  }
  0x7b   : > { %595 = vmatprep.subr.bf16.mxu0 %v892_v0  ;;  %611 = vmatprep.mubr.msk.bf16.mxu0 %vm893_vm0, %v892_v0  ;;  %v703_v3 = vld [vmem:[#allocation2 + $0x10] sm:$0xff]   ;;  %v704_v4 = vld [vmem:[#allocation2 + $0x18] sm:$0xff]   ;;  %v705_v7 = vld [vmem:[#allocation2 + $0x20] sm:$0xff]   ;;  %vm305_vm2 = vsmask.f32 256  ;;  %s271_s30 = scalar_lea.vmem [#allocation8], %s1116_s29 }
  0x7c   : > { %596 = vmatpush3.bf16.msra.mxu0 %v701_v1  ;;  %v279_v5 = vld [vmem:[%s235_s25] sm:$0xff]  ;;  %v280_v6 = vld [vmem:[%s235_s25 + $0x8] sm:$0xff]  ;;  %vm306_vm3 = vmand %vm304_vm1, %vm305_vm2  ;;  %s433_s7 = sshll.u32 %s271_s30, 4  ;;  %s585_s8 = sshll.u32 %s875_s15, 8  ;;  %s1125_s7 = int_to_ptr.vmem [resolvable:$true] %s433_s7 }
  0x7d   : > { %597 = vmatprep.subr.bf16.mxu0 %v892_v0  ;;  %v291_v8 = vpack.c.bf16 %v280_v6, %v279_v5  ;;  %v706_v9 = vld [vmem:[#allocation2 + $0x28] sm:$0xff]   ;;  %v707_v11 = vld [vmem:[#allocation2 + $0x30] sm:$0xff]   ;;  %v290_v12 = vpack.c.bf16 %v279_v5, %v279_v5  ;;  %v708_v15 = vld [vmem:[#allocation2 + $0x38] sm:$0xff]   ;;  %s1130_s9 = scalar_lea.hbm %s1183_s3, %s585_s8  ;;  %s1134_s15 = scalar_lea.sflag [#allocation4], %s233_s26 }
  0x7e   : > { %s797_s22 = scalar_lea.vmem %s1125_s7, 256  ;;  %p1208_p4 = scmp.ne.s32.totalorder %s1197_s28, 0 }
  0x7f   : > { %v297_v10 = vshrl.u32 %v291_v8, 16  ;;  %v300_v14 = vshll.u32 %v291_v8, 16  ;;  %v293_v16 = vshrl.u32 %v290_v12, 16  ;;  %p798_p3 = scmp.ne.s32.totalorder %s1125_s7, %s797_s22  ;;  %s894_s20 = smov [#allocation8]  }
  0x80   : > { %598 = vmatpush3.bf16.msra.mxu0 %v702_v2  ;;  %s801_s21 = sshll.u32 %s894_s20, 4  ;;  %s802_s21 = int_to_ptr.vmem [resolvable:$false] %s801_s21 }
  0x81   : > { %599 = vmatprep.subr.bf16.mxu0 %v892_v0  ;;  %v299_v13 = vrot.slane %v297_v10, 7  ;;  %p799_p1 = pnand %p798_p3, %p1208_p4  ;;  %s803_s23 = scalar_lea.vmem %s802_s21, 512 }
  0x82   : > { %p804_p13 = scmp.lt.s32.totalorder %s1125_s7, %s802_s21  ;;  %p805_p8 = scmp.lt.s32.totalorder %s803_s23, %s797_s22 }
  0x83   : > { %v302_v17 = vor.u32 %v300_v14, %v299_v13  ;;  %p800_p11 = pneg %p799_p1 }
  0x84   : > { %600 = vmatpush3.bf16.msra.mxu0 %v703_v3  ;;  %p806_p5 = por %p805_p8, %p804_p13 }
  0x85   : > { %601 = vmatprep.subr.bf16.mxu0 %v892_v0  ;;  %v307_v18 = vsel %vm306_vm3, %v293_v16, %v302_v17 }
  0x86   : > { %p807_p7 = pnand %p806_p5, %p800_p11 }
  0x88   : > { %602 = vmatpush3.bf16.msra.mxu0 %v704_v4 }
  0x89   : > { %603 = vmatprep.subr.bf16.mxu0 %v892_v0 }
  0x8c   : > { %604 = vmatpush3.bf16.msra.mxu0 %v705_v7 }
  0x8d   : > { %605 = vmatprep.subr.bf16.mxu0 %v892_v0 }
  0x90   : > { %606 = vmatpush3.bf16.msra.mxu0 %v706_v9 }
  0x91   : > { %607 = vmatprep.subr.bf16.mxu0 %v892_v0 }
  0x94   : > { %608 = vmatpush3.bf16.msra.mxu0 %v707_v11 }
  0x95   : > { %609 = vmatprep.subr.bf16.mxu0 %v892_v0 }
  0x98   : > { %610 = vmatpush3.bf16.msra.mxu0 %v708_v15 }
  0x9b   : > { %612 = vmatmul.mubr.bf16.vlgmr.msra.gmra.mrb[0].mxu0 %v307_v18 }
 0x16e   : > { %v406_v19 = vpop.f32.mrb[0].mxu0 }
 0x16f   : > { %v413_v20 = vmul.f32 0.033333335, %v406_v19  ;;  %v613_v21 = vpop.f32.mrb[1].mxu0 }
 0x170   : > { %v409_v22 = vpop.f32.mrb[2].mxu0 }
 0x171   : > { %415 = vst [vmem:[%s271_s30] sm:$0xff] %v413_v20  ;;  %v414_v23 = vmul.f32 0.033333335, %v409_v22  ;;  %v614_v24 = vpop.f32.mrb[3].mxu0 }
 0x173   : > { %416 = vst [vmem:[%s271_s30 + $0x8] sm:$0xff] %v414_v23 }
 0x174   : > { %810 = shalt.err (!%p807_p7)
}
 0x175   : > { %s811_s10 = scalar_lea.hbm %s1130_s9, 256  ;;  %s815_s18 = scalar_lea.hbm %s1183_s3, 2048 }
 0x176   : > { %p812_p9 = scmp.ne.s32.totalorder %s1130_s9, %s811_s10  ;;  %p816_p10 = scmp.lt.u32.totalorder %s1130_s9, %s1183_s3 }
 0x177   : > { %p817_p2 = scmp.lt.u32.totalorder %s815_s18, %s811_s10  ;;  %p819_p3 = scmp.lt.u32.totalorder %s811_s10, %s1130_s9 }
 0x178   : > { %p813_p12 = pnand %p812_p9, %p1208_p4 }
 0x179   : > { %p818_p0 = por %p817_p2, %p816_p10 }
 0x17a   : > { %p814_p6 = pneg %p813_p12 }
 0x17b   : > { %p820_p1 = por %p819_p3, %p818_p0 }
 0x17d   : > { %p821_p11 = pnand %p820_p1, %p814_p6 }
 0x17f   : > { %824 = shalt.err (!%p821_p11)
}
 0x180   : > { %s895_s29 = smov 128   ;;  %s896_s5 = smov 8  }
 0x181   : > { %623 = dma.vmem_to_hbm [thread:$0]  (%p1208_p4), %s1125_s7, 256, %s1130_s9, %s1134_s15, %s895_s29, %s895_s29, %s896_s5  }
 0x182 PF: > { %p643_p13 = scmp.ge.s32.totalorder %s883_s17, 2  ;;  %s448_s25 = sand.u32 1, %s863_s12  }
 0x183   : > { %p1209_p8 = scmp.ne.s32.totalorder %s1198_s4, 0  ;;  %s449_s30 = scalar_lea.sflag [#allocation4], %s448_s25 }
 0x185   : > { %p637_p5 = pnand %p643_p13, %p1209_p8 }
 0x187   : > { %858 = dma.done.wait (!%p637_p5), %s449_s30, 256  }
 0x188   : > { %860 = vsyncadd (!%p637_p5), %s449_s30, 4294967040  ;;  %s20_s17 = sadd.s32 1, %s883_s17   ;;  %s1210_s28 = sld [smem:[#allocation12_spill]] }
 0x189   : > { %p17_p7 = scmp.ge.s32.totalorder %s20_s17, 10   ;;  %s1211_s12 = smov %s867_s13 }
 0x18a   : > { %s1212_s13 = smov %s871_s14  ;;  %s1213_s14 = smov %s964_s24 }
 0x18b   : > { %s1214_s15 = smov %s879_s16  ;;  %19 = sbr.rel (!%p17_p7) target bundleno = 9 (0x9), region = 93 }
 0x18e   : > { %s1215_s16 = smov %s1210_s28 }
 0x192   :  { %454 = vsyncpa [#allocation3], 1 }
 0x193   :  { %456 = vsyncpa [#allocation3 + $0x1], 1 }
 0x194   :  { %457 = vsyncpa [#allocation6], 1 }
 0x195   :  { %459 = vsyncpa [#allocation6 + $0x1], 1 }
 0x196   :  { %460 = vsyncpa [#allocation4], 1 }
 0x197   :  { %462 = vsyncpa [#allocation4 + $0x1], 1 }

</bundles_post_ra>
